<compile_context>
chip_gen: v6e
topology: v6e:2x2x1
jax: 0.10.0
libtpu: 0.0.40
codegen_flags: <defaults>
</compile_context>

<pallas_src>
import functools

import jax
import jax.numpy as jnp
from jax.experimental import pallas as pl
from jax.experimental.pallas import tpu as pltpu

LANE = 128               # lane width (last-dim tile)
SUB = 8                  # sublane count
CONST_LANE = LANE - 1    # lane carrying the constant 1.0 that folds biases in

# Packed-parameter layout (bf16, lane-dense, 2 full (128,128) slabs):
#   rows [  0,128): W1 zero-padded; row 127 = b1; [127,127] = 1.0  -> h[:,127]==1
#   rows [128,256): [w2 | w3 | 0] zero-padded;    row 127 = [b2 | b3 | 0]
W1_ROW0 = 0
WH_ROW0 = LANE
TOTAL_ROWS = 2 * LANE    # 256


def actor_critic_kernel(x_ref, p_ref, out_ref, *, outputs):
    # inject the constant-1 bias lane into this batch tile (stays bf16)
    lane_x = jax.lax.broadcasted_iota(jnp.int32, x_ref.shape, 1)
    x = jnp.where(lane_x == CONST_LANE, 1.0, x_ref[...])              # (TB,128) bf16

    # trunk: relu(x @ W1 + b1); bias folded via the constant-1 lane.
    # p_ref slices are taken at point of use to keep live ranges short.
    h = jnp.maximum(
        jnp.dot(x, p_ref[W1_ROW0:W1_ROW0 + LANE, :],
                preferred_element_type=jnp.float32), 0.0)             # f32, h[:,127]==1

    # fused heads: cols [0,O) = action logits, col O = value (biases folded)
    logits = jnp.dot(h.astype(jnp.bfloat16),
                     p_ref[WH_ROW0:WH_ROW0 + LANE, :],
                     preferred_element_type=jnp.float32)              # (TB,128) f32

    # masked, numerically-stable softmax over the first `outputs` lanes
    lane = jax.lax.broadcasted_iota(jnp.int32, logits.shape, 1)
    masked = jnp.where(lane < outputs, logits, -jnp.inf)
    m = jnp.max(masked, axis=-1, keepdims=True)
    e = jnp.exp(masked - m)                       # exp(-inf) == 0 on pad/value lanes
    probs = e / jnp.sum(e, axis=-1, keepdims=True)   # exact divide (slots have slack)

    # single lane-dense store: cols [0,O) = probs, col O = value, rest = 0
    out_ref[...] = probs + jnp.where(lane == outputs, logits, 0.0)


@functools.partial(jax.jit, static_argnames=("outputs",))
def actor_critic_forward(x, packed_params, *, outputs):
    """x: (B, inputs) f32; packed_params: (TOTAL_ROWS, 128) bf16."""
    B, I = x.shape
    assert I <= CONST_LANE and outputs + 1 <= LANE

    # batch tile: one whole-vreg-multiple tile for small batches; 256-row tiles
    # at scale (full MXU row cadence on v6e/v7x, tiny vs v7x's 64 MiB VMEM).
    if B <= 256:
        TB = max(SUB, ((B + SUB - 1) // SUB) * SUB)
    else:
        TB = 256
    B_pad = ((B + TB - 1) // TB) * TB

    # pad inside the jit (fuses with the kernel launch), store bf16 for the DMA
    x_pad = jnp.pad(x.astype(jnp.bfloat16), ((0, B_pad - B), (0, LANE - I)))

    out = pl.pallas_call(
        functools.partial(actor_critic_kernel, outputs=outputs),
        out_shape=jax.ShapeDtypeStruct((B_pad, LANE), jnp.float32),
        grid=(B_pad // TB,),
        in_specs=[
            pl.BlockSpec((TB, LANE), lambda i: (i, 0)),
            # constant index_map -> the ~64 KiB bf16 weight slab is DMA'd once
            # and stays VMEM-resident across all batch-grid steps
            pl.BlockSpec((TOTAL_ROWS, LANE), lambda i: (0, 0)),
        ],
        out_specs=pl.BlockSpec((TB, LANE), lambda i: (i, 0)),
        compiler_params=pltpu.CompilerParams(
            dimension_semantics=("parallel",)),   # shards batch over 2 TCs on v7x
    )(x_pad, packed_params)

    action_prob = out[:B, :outputs]
    state_values = out[:B, outputs:outputs + 1]
    return action_prob, state_values


def init_params(key, inputs, outputs, neurons):
    """nn.Linear-style U(-1/sqrt(fan_in), +1/sqrt(fan_in)) init.
    Weights stored as (in, out) — already transposed vs. PyTorch."""
    ks = jax.random.split(key, 6)

    def lin(kw, kb, fan_in, fan_out):
        bound = 1.0 / jnp.sqrt(float(fan_in))
        w = jax.random.uniform(kw, (fan_in, fan_out), jnp.float32, -bound, bound)
        b = jax.random.uniform(kb, (1, fan_out), jnp.float32, -bound, bound)
        return w, b

    w1, b1 = lin(ks[0], ks[1], inputs, neurons)    # affine1
    w2, b2 = lin(ks[2], ks[3], neurons, outputs)   # action_head
    w3, b3 = lin(ks[4], ks[5], neurons, 1)         # value_head
    return {"w1": w1, "b1": b1, "w2": w2, "b2": b2, "w3": w3, "b3": b3}


def pack_params(p, inputs, outputs, neurons):
    """Pack weights + folded biases into one lane-dense (256, 128) bf16 slab."""
    assert inputs <= CONST_LANE and neurons <= CONST_LANE and outputs + 1 <= LANE
    packed = jnp.zeros((TOTAL_ROWS, LANE), jnp.float32)
    # trunk slab: W1, b1 folded into row 127, 1.0 at [127,127] propagates the 1-lane
    packed = packed.at[W1_ROW0:W1_ROW0 + inputs, :neurons].set(p["w1"])
    packed = packed.at[W1_ROW0 + CONST_LANE, :neurons].set(p["b1"][0])
    packed = packed.at[W1_ROW0 + CONST_LANE, CONST_LANE].set(1.0)
    # fused head slab: [w2 | w3], [b2 | b3] folded into row 127
    packed = packed.at[WH_ROW0:WH_ROW0 + neurons, :outputs].set(p["w2"])
    packed = packed.at[WH_ROW0:WH_ROW0 + neurons, outputs].set(p["w3"][:, 0])
    packed = packed.at[WH_ROW0 + CONST_LANE, :outputs].set(p["b2"][0])
    packed = packed.at[WH_ROW0 + CONST_LANE, outputs].set(p["b3"][0, 0])
    return packed.astype(jnp.bfloat16)


def reference_forward_bf16(x, p):
    """Plain-JAX reference matching the kernel's numerics:
    bf16 weights/activations, f32 accumulation, exact softmax."""
    def bf(a):
        return a.astype(jnp.bfloat16).astype(jnp.float32)
    h = jax.nn.relu(bf(x) @ bf(p["w1"]) + bf(p["b1"]))
    logits = bf(h) @ bf(p["w2"]) + bf(p["b2"])
    value = bf(h) @ bf(p["w3"]) + bf(p["b3"])
    return jax.nn.softmax(logits, axis=-1), value


if __name__ == "__main__":
    B, INPUTS, OUTPUTS, NEURONS = 2, 16, 4, 32

    key = jax.random.PRNGKey(0)
    kx, kp = jax.random.split(key)
    x = jax.random.normal(kx, (B, INPUTS), jnp.float32)
    params = init_params(kp, INPUTS, OUTPUTS, NEURONS)
    packed = pack_params(params, INPUTS, OUTPUTS, NEURONS)

    action_prob, state_values = actor_critic_forward(x, packed, outputs=OUTPUTS)
    jax.block_until_ready((action_prob, state_values))

    # sanity check vs. plain-JAX reference (same bf16 weight rounding)
    ref_prob, ref_val = reference_forward_bf16(x, params)
    assert action_prob.shape == (B, OUTPUTS)
    assert state_values.shape == (B, 1)
    assert jnp.allclose(action_prob, ref_prob, atol=2e-3, rtol=2e-3)
    assert jnp.allclose(state_values, ref_val, atol=2e-3, rtol=2e-3)
    # exact softmax divide -> probs sum to 1 within f32 rounding
    assert jnp.allclose(jnp.sum(action_prob, axis=-1), 1.0, atol=1e-5)

    print("KERNEL_OK")
</pallas_src>

<mosaic_0001>
module attributes {stable_mosaic.version = 11 : i64} {
  func.func @actor_critic_kernel(%arg0: i32, %arg1: memref<8x128xbf16, #tpu.memory_space<vmem>>, %arg2: memref<256x128xbf16, #tpu.memory_space<vmem>>, %arg3: memref<8x128xf32, #tpu.memory_space<vmem>>) attributes {dimension_semantics = [#tpu.dimension_semantics<parallel>], iteration_bounds = array<i64: 1>, scalar_prefetch = 0 : i64, scratch_operands = 0 : i64, tpu.core_type = #tpu.core_type<tc>, window_params = [{transform_indices = @transform_0, window_bounds = array<i64: 8, 128>}, {pipeline_mode = #tpu.pipeline_mode<synchronous>, transform_indices = @transform_1, window_bounds = array<i64: 256, 128>}, {transform_indices = @transform_2, window_bounds = array<i64: 8, 128>}]} {
    %0 = tpu.iota {dimensions = array<i32: 1>} : vector<8x128xi32>
    %c127_i32 = arith.constant 127 : i32
    %1 = vector.broadcast %c127_i32 : i32 to vector<8x128xi32>
    %2 = arith.cmpi eq, %0, %1 : vector<8x128xi32>
    %c0 = arith.constant 0 : index
    %c0_0 = arith.constant 0 : index
    %3 = vector.load %arg1[%c0, %c0_0] : memref<8x128xbf16, #tpu.memory_space<vmem>>, vector<8x128xbf16>
    %cst = arith.constant 1.000000e+00 : f32
    %4 = arith.truncf %cst : f32 to bf16
    %5 = vector.broadcast %4 : bf16 to vector<8x128xbf16>
    %6 = arith.select %2, %5, %3 : vector<8x128xi1>, vector<8x128xbf16>
    %c0_1 = arith.constant 0 : index
    %c0_2 = arith.constant 0 : index
    %7 = vector.load %arg2[%c0_1, %c0_2] : memref<256x128xbf16, #tpu.memory_space<vmem>>, vector<128x128xbf16>
    %cst_3 = arith.constant dense<0.000000e+00> : vector<8x128xf32>
    %8 = tpu.matmul %6, %7, %cst_3 {dimension_numbers = #tpu.dot_dimension_numbers<[1], [0], [0], [1], [0, 0, 1, 1], [], []>} : vector<8x128xbf16>, vector<128x128xbf16>, vector<8x128xf32> -> vector<8x128xf32>
    %cst_4 = arith.constant 0.000000e+00 : f32
    %9 = vector.broadcast %cst_4 : f32 to vector<8x128xf32>
    %10 = arith.maximumf %8, %9 : vector<8x128xf32>
    %11 = arith.truncf %10 : vector<8x128xf32> to vector<8x128xbf16>
    %c128 = arith.constant 128 : index
    %c0_5 = arith.constant 0 : index
    %12 = vector.load %arg2[%c128, %c0_5] : memref<256x128xbf16, #tpu.memory_space<vmem>>, vector<128x128xbf16>
    %cst_6 = arith.constant dense<0.000000e+00> : vector<8x128xf32>
    %13 = tpu.matmul %11, %12, %cst_6 {dimension_numbers = #tpu.dot_dimension_numbers<[1], [0], [0], [1], [0, 0, 1, 1], [], []>} : vector<8x128xbf16>, vector<128x128xbf16>, vector<8x128xf32> -> vector<8x128xf32>
    %14 = tpu.iota {dimensions = array<i32: 1>} : vector<8x128xi32>
    %c4_i32 = arith.constant 4 : i32
    %15 = vector.broadcast %c4_i32 : i32 to vector<8x128xi32>
    %16 = arith.cmpi slt, %14, %15 : vector<8x128xi32>
    %cst_7 = arith.constant 0xFF800000 : f32
    %17 = vector.broadcast %cst_7 : f32 to vector<8x128xf32>
    %18 = arith.select %16, %13, %17 : vector<8x128xi1>, vector<8x128xf32>
    %cst_8 = arith.constant dense<0xFF800000> : vector<8xf32>
    %19 = vector.multi_reduction <maximumf>, %18, %cst_8 [1] : vector<8x128xf32> to vector<8xf32>
    %20 = vector.shape_cast %19 : vector<8xf32> to vector<8x1xf32>
    %21 = vector.broadcast %20 : vector<8x1xf32> to vector<8x128xf32>
    %22 = arith.subf %18, %21 : vector<8x128xf32>
    %23 = math.exp %22 : vector<8x128xf32>
    %cst_9 = arith.constant dense<0.000000e+00> : vector<8xf32>
    %24 = vector.multi_reduction <add>, %23, %cst_9 [1] : vector<8x128xf32> to vector<8xf32>
    %25 = vector.shape_cast %24 : vector<8xf32> to vector<8x1xf32>
    %26 = vector.broadcast %25 : vector<8x1xf32> to vector<8x128xf32>
    %27 = arith.divf %23, %26 : vector<8x128xf32>
    %c4_i32_10 = arith.constant 4 : i32
    %28 = vector.broadcast %c4_i32_10 : i32 to vector<8x128xi32>
    %29 = arith.cmpi eq, %14, %28 : vector<8x128xi32>
    %cst_11 = arith.constant 0.000000e+00 : f32
    %30 = vector.broadcast %cst_11 : f32 to vector<8x128xf32>
    %31 = arith.select %29, %13, %30 : vector<8x128xi1>, vector<8x128xf32>
    %32 = arith.addf %27, %31 : vector<8x128xf32>
    %c0_12 = arith.constant 0 : index
    %c0_13 = arith.constant 0 : index
    %33 = vector.load %arg3[%c0_12, %c0_13] : memref<8x128xf32, #tpu.memory_space<vmem>>, vector<8x128xf32>
    tpu.vector_store %arg3[%c0_12, %c0_13], %32 {strides = array<i32>} : memref<8x128xf32, #tpu.memory_space<vmem>>, vector<8x128xf32>,
    return
  }
  func.func @transform_0(%arg0: i32) -> (i32, i32) {
    %c0_i32 = arith.constant 0 : i32
    %c0_i32_0 = arith.constant 0 : i32
    return %arg0, %c0_i32 : i32, i32
  }
  func.func @transform_1(%arg0: i32) -> (i32, i32) {
    %c0_i32 = arith.constant 0 : i32
    %c0_i32_0 = arith.constant 0 : i32
    %c0_i32_1 = arith.constant 0 : i32
    return %c0_i32, %c0_i32_0 : i32, i32
  }
  func.func @transform_2(%arg0: i32) -> (i32, i32) {
    %c0_i32 = arith.constant 0 : i32
    %c0_i32_0 = arith.constant 0 : i32
    return %arg0, %c0_i32 : i32, i32
  }
}

</mosaic_0001>

<bundles_post_ra>
// kernel: actor_critic_forward.1
= control target key start
LH: loop header
LB: loop body
LE: loop exit
PB: predicated region body
PF: predicated region fallthrough
CT: control target
= control target key end

     0   :  { %7 = vsyncpa [#allocation3], 0  ;;  %s384_s9 = smov [#allocation2]   ;;  %s413_s0 = inlined_call_operand.vmem [shape: bf16[8,128], index: 0, kind: input, shape index: {}]   ;;  %s414_s1 = inlined_call_operand.hbm [shape: bf16[256,128], index: 1, kind: input, shape index: {}]   ;;  %s415_s2 = inlined_call_operand.vmem [shape: f32[8,128], index: 2, kind: output, shape index: {}]  }
   0x1   :  { %s15_s10 = sshll.u32 %s384_s9, 4  ;;  %s16_s10 = int_to_ptr.vmem [resolvable:$true] %s15_s10 }
   0x2   :  { %s370_s11 = scalar_lea.vmem %s16_s10, 2048  ;;  %p375_p1 = scmp.lt.s32.totalorder %s16_s10, %s16_s10 }
   0x3   :  { %p371_p0 = scmp.ne.s32.totalorder %s16_s10, %s370_s11  ;;  %p376_p2 = scmp.lt.s32.totalorder %s370_s11, %s370_s11 }
   0x5   :  { %p377_p3 = por %p376_p2, %p375_p1 }
   0x7   :  { %p378_p4 = pnand %p377_p3, %p371_p0 }
   0x9   :  { %381 = shalt.err (!%p378_p4)
}
   0xa   :  { %s385_s12 = smov 64   ;;  %s386_s13 = smov 4  }
   0xb   :  { %21 = dma.hbm_to_vmem [thread:$0]  %s414_s1, 2048, %s16_s10, [#allocation3], %s385_s12, %s385_s12, %s386_s13  }
   0xc   :  { %382 = dma.done.wait [#allocation3], 2048  }
   0xd   :  { %383 = vsyncadd [#allocation3], 4294965248  ;;  %v387_v0 = vmov 0.0   ;;  %vm388_vm0 = vmmov 0   ;;  %v342_v1 = vld [vmem:[#allocation2 + $0x38] sm:$0xff]   ;;  %v343_v2 = vld [vmem:[#allocation2 + $0x30] sm:$0xff]   ;;  %v27_v9 = vlaneseq }
   0xe   :  { %297 = vmatprep.subr.bf16.mxu0 %v387_v0  ;;  %313 = vmatprep.mubr.msk.bf16.mxu0 %vm388_vm0, %v387_v0  ;;  %v344_v3 = vld [vmem:[#allocation2 + $0x28] sm:$0xff]   ;;  %v345_v4 = vld [vmem:[#allocation2 + $0x20] sm:$0xff]   ;;  %v350_v5 = vld [vmem:[#allocation2 + $0x78] sm:$0xff]  }
   0xf   :  { %317 = vmatprep.subr.bf16.mxu1 %v387_v0  ;;  %333 = vmatprep.mubr.msk.bf16.mxu1 %vm388_vm0, %v387_v0  ;;  %v351_v6 = vld [vmem:[#allocation2 + $0x70] sm:$0xff]   ;;  %v346_v7 = vld [vmem:[#allocation2 + $0x18] sm:$0xff]   ;;  %v352_v8 = vld [vmem:[#allocation2 + $0x68] sm:$0xff]   ;;  %v28_v12 = vand.u32 127, %v27_v9 }
  0x10   :  { %298 = vmatpush3.bf16.msra.mxu0 %v342_v1  ;;  %318 = vmatpush3.bf16.msra.mxu1 %v350_v5  ;;  %v347_v10 = vld [vmem:[#allocation2 + $0x10] sm:$0xff]   ;;  %v353_v11 = vld [vmem:[#allocation2 + $0x60] sm:$0xff]   ;;  %v348_v13 = vld [vmem:[#allocation2 + $0x8] sm:$0xff]  }
  0x11   :  { %299 = vmatprep.subr.bf16.mxu0 %v387_v0  ;;  %319 = vmatprep.subr.bf16.mxu1 %v387_v0  ;;  %v354_v14 = vld [vmem:[#allocation2 + $0x58] sm:$0xff]   ;;  %vm29_vm1 = vcmp.eq.s32.totalorder %v28_v12, 127  ;;  %v349_v15 = vld [vmem:[#allocation2] sm:$0xff]   ;;  %v355_v17 = vld [vmem:[#allocation2 + $0x50] sm:$0xff]   ;;  %vm243_vm3 = vcmp.lt.s32.totalorder %v28_v12, 4  ;;  %vm254_vm4 = vcmp.eq.s32.totalorder %v28_v12, 4 }
  0x12   :  { %v30_v16 = vld [vmem:[%s413_s0] sm:$0xf]  ;;  %vm31_vm2 = vmpackc.low %vm29_vm1, %vm29_vm1  ;;  %v356_v19 = vld [vmem:[#allocation2 + $0x48] sm:$0xff]  }
  0x13   :  { %v32_v18 = vsel %vm31_vm2, 1065369472, %v30_v16  ;;  %v357_v20 = vld [vmem:[#allocation2 + $0x40] sm:$0xff]  }
  0x14   :  { %300 = vmatpush3.bf16.msra.mxu0 %v343_v2  ;;  %320 = vmatpush3.bf16.msra.mxu1 %v351_v6 }
  0x15   :  { %301 = vmatprep.subr.bf16.mxu0 %v387_v0  ;;  %321 = vmatprep.subr.bf16.mxu1 %v387_v0 }
  0x18   :  { %302 = vmatpush3.bf16.msra.mxu0 %v344_v3  ;;  %322 = vmatpush3.bf16.msra.mxu1 %v352_v8 }
  0x19   :  { %303 = vmatprep.subr.bf16.mxu0 %v387_v0  ;;  %323 = vmatprep.subr.bf16.mxu1 %v387_v0 }
  0x1c   :  { %304 = vmatpush3.bf16.msra.mxu0 %v345_v4  ;;  %324 = vmatpush3.bf16.msra.mxu1 %v353_v11 }
  0x1d   :  { %305 = vmatprep.subr.bf16.mxu0 %v387_v0  ;;  %325 = vmatprep.subr.bf16.mxu1 %v387_v0 }
  0x20   :  { %306 = vmatpush3.bf16.msra.mxu0 %v346_v7  ;;  %326 = vmatpush3.bf16.msra.mxu1 %v354_v14 }
  0x21   :  { %307 = vmatprep.subr.bf16.mxu0 %v387_v0  ;;  %327 = vmatprep.subr.bf16.mxu1 %v387_v0 }
  0x24   :  { %308 = vmatpush3.bf16.msra.mxu0 %v347_v10  ;;  %328 = vmatpush3.bf16.msra.mxu1 %v355_v17 }
  0x25   :  { %309 = vmatprep.subr.bf16.mxu0 %v387_v0  ;;  %329 = vmatprep.subr.bf16.mxu1 %v387_v0 }
  0x28   :  { %310 = vmatpush3.bf16.msra.mxu0 %v348_v13  ;;  %330 = vmatpush3.bf16.msra.mxu1 %v356_v19 }
  0x29   :  { %311 = vmatprep.subr.bf16.mxu0 %v387_v0  ;;  %331 = vmatprep.subr.bf16.mxu1 %v387_v0 }
  0x2c   :  { %312 = vmatpush3.bf16.msra.mxu0 %v349_v15  ;;  %332 = vmatpush3.bf16.msra.mxu1 %v357_v20 }
  0x2f   :  { %314 = vmatmul.mubr.bf16.vlgmr.msra.gmra.mxu0 %v32_v18 }
  0xef   :  { %v131_v21 = vpop.f32.mrf.mxu0 }
  0xf0   :  { %v137_v22 = vmax.f32 %v131_v21, 0.0 }
  0xf1   :  { %v315_v23 = vpop.f32.mrf.mxu0 }
  0xf2   :  { %v138_v24 = vpack.c.bf16 %v137_v22, %v137_v22 }
  0xf3   :  { %v134_v25 = vpop.f32.mrf.mxu0 }
  0xf4   :  { %334 = vmatmul.mubr.bf16.vlgmr.msra.gmra.mxu1 %v138_v24 }
  0xf5   :  { %v316_v26 = vpop.f32.mrf.mxu0 }
 0x1b4   :  { %v237_v27 = vpop.f32.mrf.mxu1 }
 0x1b5   :  { %v244_v28 = vsel %vm243_vm3, %v237_v27, -inf  ;;  %v255_v39 = vsel %vm254_vm4, %v237_v27, 0.0 }
 0x1b6   :  { %245 = vmax.xlane.f32.xlu0 %v244_v28  ;;  %v335_v29 = vpop.f32.mrf.mxu1 }
 0x1b8   :  { %v240_v30 = vpop.f32.mrf.mxu1 }
 0x1ba   :  { %v336_v31 = vpop.f32.mrf.mxu1 }
 0x23f   :  { %v246_v32 = vpop.xlane.xlu0 %245 }
 0x240   :  { %v247_v33 = vsub.f32 %v244_v28, %v246_v32 }
 0x242   :  { %v248_v34 = vmul.f32 1.442695, %v247_v33 }
 0x244   :  { %358 = vpow2.f32 %v248_v34 }
 0x251   :  { %v359_v35 = vpop.eup %358 }
 0x252   :  { %250 = vadd.xlane.f32.xlu0 %v359_v35 }
 0x2db   :  { %v251_v36 = vpop.xlane.xlu0 %250 }
 0x2dc   :  { %360 = vrcp.f32 %v251_v36 }
 0x2e9   :  { %v361_v37 = vpop.eup %360 }
 0x2ea   :  { %v253_v38 = vmul.f32 %v361_v37, %v359_v35 }
 0x2ec   :  { %v256_v40 = vadd.f32 %v255_v39, %v253_v38 }
 0x2ee   :  { %257 = vst [vmem:[%s415_s2] sm:$0xff] %v256_v40 }
 0x2ef   :  { %262 = vsyncpa [#allocation3], 1 }

</bundles_post_ra>
